<compile_context>
chip_gen: v6e
topology: v6e:2x2x1
jax: 0.10.0
libtpu: 0.0.40
codegen_flags: <defaults>
</compile_context>

<pallas_src>
import jax
import jax.numpy as jnp
from jax.experimental import pallas as pl
from jax.experimental.pallas import tpu as pltpu


def _round_up(x, m):
    return ((x + m - 1) // m) * m


def _pick_tile(size, max_tile, align=128):
    """Largest power-of-two-ish tile <= max_tile dividing round_up(size, align)."""
    size_a = _round_up(size, align)
    t = max_tile
    while t > align and size_a % t != 0:
        t //= 2
    return int(min(t, size_a))


def _make_kernel(*, has_bias, multi_k, int8_act):
    """Build a matmul kernel specialised on bias / K-grid / activation dtype."""

    def finalize(acc, s_ref, b_ref, o_ref):
        # (tm, tn) * (1, tn) broadcast FMA on the VPU; no transpose.
        y = acc.astype(jnp.float32) * s_ref[...]
        if has_bias:
            y = y + b_ref[...]
        o_ref[...] = y.astype(o_ref.dtype)

    def kernel(*refs):
        if multi_k:
            refs, acc_ref = refs[:-1], refs[-1]
        x_ref, w_ref, s_ref = refs[0], refs[1], refs[2]
        b_ref = refs[3] if has_bias else None
        o_ref = refs[-1]

        if int8_act:
            # W8A8: int8 x int8 on the MXU, exact int32 accumulation.
            part = jnp.dot(x_ref[...], w_ref[...],
                           preferred_element_type=jnp.int32)
        else:
            # W8A16: dequantize-on-the-fly (int8 -> bf16 is exact); per-channel
            # scale is factored out and applied once after the reduction.
            part = jnp.dot(x_ref[...], w_ref[...].astype(jnp.bfloat16),
                           preferred_element_type=jnp.float32)

        if multi_k:
            k = pl.program_id(2)

            @pl.when(k == 0)
            def _init():
                acc_ref[...] = jnp.zeros_like(acc_ref)

            acc_ref[...] += part

            @pl.when(k == pl.num_programs(2) - 1)
            def _fin():
                finalize(acc_ref[...], s_ref, b_ref, o_ref)
        else:
            finalize(part, s_ref, b_ref, o_ref)

    return kernel


def prepare_quant_linear_params(weight_q, weight_scale, bias=None, input_scale=None,
                                *, tn_max=1024, tk_max=2048):
    """One-time (model-load) weight preprocessing.

    Transposes the int8 weight to (K, N), pads to 128-aligned dims, and lays the
    per-output-channel scale / bias out as lane-dense (1, N) f32 rows.  Doing
    this once avoids re-copying the full weight in HBM on every forward call.
    """
    weight_q = jnp.asarray(weight_q)
    N, K = weight_q.shape

    tn = _pick_tile(N, tn_max)
    tk = _pick_tile(K, tk_max)
    Np, Kp = _round_up(N, 128), _round_up(K, 128)   # tn | Np, tk | Kp by construction

    w_kn = weight_q.T                                # (K, N), one-time transpose
    if (Kp, Np) != (K, N):
        w_kn = jnp.pad(w_kn, ((0, Kp - K), (0, Np - N)))

    scale = jnp.asarray(weight_scale, jnp.float32).reshape(1, N)
    if Np != N:
        scale = jnp.pad(scale, ((0, 0), (0, Np - N)))

    b = None
    if bias is not None:
        b = jnp.asarray(bias, jnp.float32).reshape(1, N)
        if Np != N:
            b = jnp.pad(b, ((0, 0), (0, Np - N)))

    in_s = None
    if input_scale is not None:
        in_s = jnp.asarray(input_scale, jnp.float32).reshape(-1)[0]

    return dict(w_kn=w_kn, scale=scale, bias=b, input_scale=in_s,
                N=N, K=K, tn=tn, tk=tk)


def quant_linear_forward(x, params, *, tm=256, quantize_activations=False,
                         weight_buffers=2, collapse_k_for_decode=True):
    """Forward pass with pre-prepared weights (see prepare_quant_linear_params)."""
    w_kn, scale, bias = params["w_kn"], params["scale"], params["bias"]
    N, K, tn, tk = params["N"], params["K"], params["tn"], params["tk"]
    Kp, Np = w_kn.shape

    orig_shape = x.shape
    out_dtype = x.dtype
    assert orig_shape[-1] == K
    x2d = x.reshape(-1, K)
    M = x2d.shape[0]

    if quantize_activations:
        # Static W8A8 path (v5e/v6e): quantize x with the module's input_scale,
        # fold input_scale into the per-channel scale applied at finalize.
        in_s = params["input_scale"]
        assert in_s is not None, "quantize_activations=True requires input_scale"
        x2d = jnp.clip(jnp.round(x2d.astype(jnp.float32) / in_s),
                       -128.0, 127.0).astype(jnp.int8)
        scale = scale * in_s
        m_align, x_bytes, acc_dtype = 32, 1, jnp.int32
    else:
        if x2d.dtype != jnp.bfloat16:
            x2d = x2d.astype(jnp.bfloat16)   # f32 LHS would waste MXU passes + bytes
        m_align, x_bytes, acc_dtype = 16, 2, jnp.float32

    tm = min(tm, _round_up(M, m_align))
    Mp = _round_up(M, tm)
    if (Mp, Kp) != (M, K):
        x2d = jnp.pad(x2d, ((0, Mp - M), (0, Kp - K)))

    # Decode fast path: a single M block and K small enough to keep resident ->
    # collapse the K grid axis (drops the accumulator scratch and the
    # init/finalize branches entirely).
    if (collapse_k_for_decode and Mp <= tm and Kp != tk
            and Kp * tn <= (4 << 20) and tm * Kp * x_bytes <= (2 << 20)):
        tk = Kp

    n_i, n_j, n_k = Mp // tm, Np // tn, Kp // tk
    has_bias = bias is not None
    multi_k = n_k > 1

    # Optional deeper pipelining of the HBM-bound int8 weight stream (decode).
    w_kwargs = {} if weight_buffers == 2 else {"pipeline_mode": pl.Buffered(weight_buffers)}

    if multi_k:
        grid = (n_i, n_j, n_k)
        x_spec = pl.BlockSpec((tm, tk), lambda i, j, k: (i, k))
        w_spec = pl.BlockSpec((tk, tn), lambda i, j, k: (k, j), **w_kwargs)
        s_spec = pl.BlockSpec((1, tn), lambda i, j, k: (0, j))
        o_spec = pl.BlockSpec((tm, tn), lambda i, j, k: (i, j))
        scratch = [pltpu.VMEM((tm, tn), acc_dtype)]
        dims = ("parallel", "parallel", "arbitrary")
    else:
        grid = (n_i, n_j)
        x_spec = pl.BlockSpec((tm, tk), lambda i, j: (i, 0))
        w_spec = pl.BlockSpec((tk, tn), lambda i, j: (0, j), **w_kwargs)
        s_spec = pl.BlockSpec((1, tn), lambda i, j: (0, j))
        o_spec = pl.BlockSpec((tm, tn), lambda i, j: (i, j))
        scratch = []
        dims = ("parallel", "parallel")

    in_specs = [x_spec, w_spec, s_spec]
    inputs = [x2d, w_kn, scale]
    if has_bias:
        in_specs.append(s_spec)   # bias shares the (1, tn) lane-dense layout
        inputs.append(bias)

    kernel = _make_kernel(has_bias=has_bias, multi_k=multi_k,
                          int8_act=quantize_activations)

    out_bytes = jnp.dtype(out_dtype).itemsize
    est_vmem = (2 * tm * tk * x_bytes                       # x double buffer
                + max(2, weight_buffers) * tk * tn          # int8 weight buffers
                + 2 * tm * tn * out_bytes                   # output double buffer
                + (tm * tn * 4 if multi_k else 0)           # accumulator
                + 4 * 8 * tn * 4)                           # scale/bias tiles
    vmem_limit = int(min(max(2 * est_vmem, 16 << 20), 64 << 20))

    out2d = pl.pallas_call(
        kernel,
        out_shape=jax.ShapeDtypeStruct((Mp, Np), out_dtype),
        grid_spec=pltpu.PrefetchScalarGridSpec(
            num_scalar_prefetch=0,
            grid=grid,
            in_specs=in_specs,
            out_specs=o_spec,
            scratch_shapes=scratch,
        ),
        compiler_params=pltpu.CompilerParams(
            dimension_semantics=dims,
            vmem_limit_bytes=vmem_limit,
        ),
    )(*inputs)

    out2d = out2d[:M, :N]
    return out2d.reshape(orig_shape[:-1] + (N,))


def vllm_real_quant_linear(x, weight_q, weight_scale, bias=None, input_scale=None,
                           *, tm=256, tn_max=1024, tk_max=2048,
                           quantize_activations=False, weight_buffers=2):
    """Convenience wrapper matching the module buffers.

    For production use, call prepare_quant_linear_params once at model load and
    quant_linear_forward per call — this wrapper re-runs the weight preprocessing
    every call and is only for API compatibility / testing.
    """
    params = prepare_quant_linear_params(weight_q, weight_scale, bias, input_scale,
                                         tn_max=tn_max, tk_max=tk_max)
    return quant_linear_forward(x, params, tm=tm,
                                quantize_activations=quantize_activations,
                                weight_buffers=weight_buffers)


if __name__ == "__main__":
    key = jax.random.PRNGKey(0)
    k1, k2, k3, k4 = jax.random.split(key, 4)

    # Small LLM-like shapes: (batch, seq, in_features) -> (batch, seq, out_features)
    batch, seq, in_features, out_features = 2, 8, 256, 384

    x = jax.random.normal(k1, (batch, seq, in_features), jnp.float32).astype(jnp.bfloat16)
    weight_q = jax.random.randint(
        k2, (out_features, in_features), -128, 128, dtype=jnp.int32
    ).astype(jnp.int8)
    weight_scale = jax.random.uniform(k3, (out_features, 1), jnp.float32) * 0.02 + 0.005
    bias = (jax.random.normal(k4, (out_features,), jnp.float32) * 0.1).astype(jnp.bfloat16)
    input_scale = jnp.asarray([0.05], jnp.float32)

    # Plain-JAX reference: dequantize weight, f32 matmul, bias.
    x_f32 = x.reshape(-1, in_features).astype(jnp.float32)
    w_deq = weight_q.astype(jnp.float32) * weight_scale
    ref = (x_f32 @ w_deq.T + bias.astype(jnp.float32)).reshape(batch, seq, out_features)

    # --- Path 1: W8A16, weights prepared once (decode fast path: single-K grid) ---
    params = prepare_quant_linear_params(weight_q, weight_scale, bias, input_scale)
    out = jax.block_until_ready(quant_linear_forward(x, params))
    assert out.shape == (batch, seq, out_features)
    assert out.dtype == x.dtype
    assert jnp.allclose(out.astype(jnp.float32), ref, atol=2e-1, rtol=2e-2)

    # --- Path 2: multi-K accumulation + no-bias variant (forced small tiles) ---
    params_mk = prepare_quant_linear_params(weight_q, weight_scale, None, None,
                                            tn_max=128, tk_max=128)
    out_nb = jax.block_until_ready(
        quant_linear_forward(x, params_mk, tm=64, collapse_k_for_decode=False))
    ref_nb = ref - bias.astype(jnp.float32)
    assert jnp.allclose(out_nb.astype(jnp.float32), ref_nb, atol=2e-1, rtol=2e-2)

    # --- Path 3: static W8A8 (int8 activations) where the MXU has an int8 path ---
    kind = jax.devices()[0].device_kind.lower()
    if any(tag in kind for tag in ("v5", "v6")):
        out_i8 = jax.block_until_ready(
            quant_linear_forward(x, params, quantize_activations=True))
        x_q = jnp.clip(jnp.round(x_f32 / input_scale[0]), -128.0, 127.0)
        ref_i8 = ((x_q @ weight_q.astype(jnp.float32).T)
                  * (input_scale[0] * weight_scale.reshape(1, -1))
                  + bias.astype(jnp.float32)).reshape(batch, seq, out_features)
        assert jnp.allclose(out_i8.astype(jnp.float32), ref_i8, atol=2e-1, rtol=2e-2)

    print("KERNEL_OK")
</pallas_src>

<mosaic_0001>
module attributes {stable_mosaic.version = 11 : i64} {
  func.func @kernel(%arg0: i32, %arg1: i32, %arg2: memref<16x256xbf16, #tpu.memory_space<vmem>>, %arg3: memref<256x128xi8, #tpu.memory_space<vmem>>, %arg4: memref<1x128xf32, #tpu.memory_space<vmem>>, %arg5: memref<1x128xf32, #tpu.memory_space<vmem>>, %arg6: memref<16x128xbf16, #tpu.memory_space<vmem>>) attributes {dimension_semantics = [#tpu.dimension_semantics<parallel>, #tpu.dimension_semantics<parallel>], iteration_bounds = array<i64: 1, 3>, scalar_prefetch = 0 : i64, scratch_operands = 0 : i64, tpu.core_type = #tpu.core_type<tc>, window_params = [{transform_indices = @transform_0, window_bounds = array<i64: 16, 256>}, {transform_indices = @transform_1, window_bounds = array<i64: 256, 128>}, {transform_indices = @transform_2, window_bounds = array<i64: 1, 128>}, {transform_indices = @transform_3, window_bounds = array<i64: 1, 128>}, {transform_indices = @transform_4, window_bounds = array<i64: 16, 128>}]} {
    %c0 = arith.constant 0 : index
    %c0_0 = arith.constant 0 : index
    %0 = vector.load %arg2[%c0, %c0_0] : memref<16x256xbf16, #tpu.memory_space<vmem>>, vector<16x256xbf16>
    %c0_1 = arith.constant 0 : index
    %c0_2 = arith.constant 0 : index
    %1 = vector.load %arg3[%c0_1, %c0_2] : memref<256x128xi8, #tpu.memory_space<vmem>>, vector<256x128xi8>
    %2 = arith.sitofp %1 : vector<256x128xi8> to vector<256x128xbf16>
    %cst = arith.constant dense<0.000000e+00> : vector<16x128xf32>
    %3 = tpu.matmul %0, %2, %cst {dimension_numbers = #tpu.dot_dimension_numbers<[1], [0], [0], [1], [0, 0, 1, 1], [], []>} : vector<16x256xbf16>, vector<256x128xbf16>, vector<16x128xf32> -> vector<16x128xf32>
    %c0_3 = arith.constant 0 : index
    %c0_4 = arith.constant 0 : index
    %4 = vector.load %arg4[%c0_3, %c0_4] : memref<1x128xf32, #tpu.memory_space<vmem>>, vector<1x128xf32>
    %5 = vector.broadcast %4 : vector<1x128xf32> to vector<16x128xf32>
    %6 = arith.mulf %3, %5 : vector<16x128xf32>
    %c0_5 = arith.constant 0 : index
    %c0_6 = arith.constant 0 : index
    %7 = vector.load %arg5[%c0_5, %c0_6] : memref<1x128xf32, #tpu.memory_space<vmem>>, vector<1x128xf32>
    %8 = vector.broadcast %7 : vector<1x128xf32> to vector<16x128xf32>
    %9 = arith.addf %6, %8 : vector<16x128xf32>
    %10 = arith.truncf %9 : vector<16x128xf32> to vector<16x128xbf16>
    %c0_7 = arith.constant 0 : index
    %c0_8 = arith.constant 0 : index
    %11 = vector.load %arg6[%c0_7, %c0_8] : memref<16x128xbf16, #tpu.memory_space<vmem>>, vector<16x128xbf16>
    tpu.vector_store %arg6[%c0_7, %c0_8], %10 {strides = array<i32>} : memref<16x128xbf16, #tpu.memory_space<vmem>>, vector<16x128xbf16>,
    return
  }
  func.func @transform_0(%arg0: i32, %arg1: i32) -> (i32, i32) {
    %c0_i32 = arith.constant 0 : i32
    %c0_i32_0 = arith.constant 0 : i32
    return %arg0, %c0_i32 : i32, i32
  }
  func.func @transform_1(%arg0: i32, %arg1: i32) -> (i32, i32) {
    %c0_i32 = arith.constant 0 : i32
    %c0_i32_0 = arith.constant 0 : i32
    return %c0_i32, %arg1 : i32, i32
  }
  func.func @transform_2(%arg0: i32, %arg1: i32) -> (i32, i32) {
    %c0_i32 = arith.constant 0 : i32
    %c0_i32_0 = arith.constant 0 : i32
    return %c0_i32, %arg1 : i32, i32
  }
  func.func @transform_3(%arg0: i32, %arg1: i32) -> (i32, i32) {
    %c0_i32 = arith.constant 0 : i32
    %c0_i32_0 = arith.constant 0 : i32
    return %c0_i32, %arg1 : i32, i32
  }
  func.func @transform_4(%arg0: i32, %arg1: i32) -> (i32, i32) {
    %c0_i32 = arith.constant 0 : i32
    return %arg0, %arg1 : i32, i32
  }
}

</mosaic_0001>

<bundles_post_ra>
// kernel: tpu_custom_call.1
= control target key start
LH: loop header
LB: loop body
LE: loop exit
PB: predicated region body
PF: predicated region fallthrough
CT: control target
= control target key end

     0   :  { %9 = vsyncpa [#allocation3], 0  ;;  %s1115_s0 = inlined_call_operand.hbm [shape: bf16[16,256], index: 0, kind: input, shape index: {}]   ;;  %s1116_s1 = inlined_call_operand.hbm [shape: s8[256,384], index: 1, kind: input, shape index: {}]   ;;  %s1117_s2 = inlined_call_operand.vmem [shape: f32[1,384], index: 2, kind: input, shape index: {}]   ;;  %s1118_s3 = inlined_call_operand.hbm [shape: f32[1,384], index: 3, kind: input, shape index: {}]   ;;  %s1119_s4 = inlined_call_operand.hbm [shape: bf16[16,384], index: 4, kind: output, shape index: {}]  }
   0x1   :  { %10 = vsyncpa [#allocation6], 0 }
   0x2   :  { %12 = vsyncpa [#allocation6 + $0x1], 0 }
   0x3   :  { %13 = vsyncpa [#allocation4], 0 }
   0x4   :  { %15 = vsyncpa [#allocation4 + $0x1], 0  ;;  %s886_s15 = smov 0   ;;  %s888_s16 = smov 0  }
   0x5   :  { %s890_s17 = smov 0   ;;  %s892_s18 = smov 0  }
   0x6   :  { %s894_s19 = smov 0   ;;  %s896_s20 = smov 0  }
   0x7 LB: > { %s30_s21 = sadd.s32 1, %s845_s19  ;;  %s66_s22 = sadd.s32 1, %s837_s17  ;;  %s849_s20 = sphi %s896_s20, %s21_s20   ;;  %s845_s19 = sphi %s894_s19, %s1143_s19   ;;  %s841_s18 = sphi %s892_s18, %s1142_s18   ;;  %s837_s17 = sphi %s890_s17, %s1141_s17   ;;  %s833_s16 = sphi %s888_s16, %s1140_s16   ;;  %s829_s15 = sphi %s886_s15, %s1139_s15  }
   0x8   : > { %p31_p0 = scmp.ge.s32.totalorder %s30_s21, 3  ;;  %p73_p1 = scmp.ne.s32.totalorder %s837_s17, %s833_s16 }
   0x9   : > { %p74_p2 = scmp.eq.s32.totalorder %s849_s20, 0  ;;  %p622_p5 = scmp.lt.s32.totalorder %s849_s20, 3 }
   0xa   : > { %s1145_s21 = smov (%p31_p0, %s30_s21), 0  ;;  %s200_s25 = sand.u32 1, %s849_s20  }
   0xb   : > { %p926_p3 = por %p74_p2, %p73_p1  ;;  %s63_s24 = ssub.s32 %s845_s19, %s1145_s21 }
   0xc   : > { %p64_p4 = scmp.eq.s32.totalorder %s63_s24, 0  ;;  %s202_s26 = sand.u32 1, %s837_s17  }
   0xd   : > { %s550_s28 = sshll.u32 %s202_s26, 6  ;;  %s551_s29 = sshll.u32 %s845_s19, 7 }
   0xe   : > { %s936_s27 = scalar_select %p64_p4, %s837_s17, %s66_s22  }
   0xf   : > { %s209_s6 = scalar_lea.hbm %s1116_s1, %s551_s29  ;;  %s204_s7 = scalar_lea.vmem [#allocation5], %s550_s28 }
  0x10   : > { %s210_s8 = sshll.u32 %s204_s7, 4  ;;  %p946_p6 = pnand %p622_p5, %p926_p3  ;;  %s211_s8 = int_to_ptr.vmem [resolvable:$true] %s210_s8 }
  0x11   : > { %s950_s10 = scalar_lea.sflag [#allocation6], %s200_s25  ;;  %s696_s11 = scalar_lea.vmem %s211_s8, 1024 }
  0x12   : > { %p685_p7 = pneg %p946_p6  ;;  %p697_p8 = scmp.ne.s32.totalorder %s211_s8, %s696_s11 }
  0x13   : > { %s851_s12 = smov [#allocation5]  }
  0x14   : > { %p699_p9 = pnand %p697_p8, %p685_p7  ;;  %s701_s13 = sshll.u32 %s851_s12, 4  ;;  %s702_s13 = int_to_ptr.vmem [resolvable:$false] %s701_s13 }
  0x15   : > { %s703_s14 = scalar_lea.vmem %s702_s13, 2048  ;;  %p704_p11 = scmp.lt.s32.totalorder %s211_s8, %s702_s13 }
  0x16   : > { %p700_p10 = pneg %p699_p9  ;;  %p705_p12 = scmp.lt.s32.totalorder %s703_s14, %s696_s11 }
  0x18   : > { %p706_p13 = por %p705_p12, %p704_p11 }
  0x1a   : > { %p707_p0 = pnand %p706_p13, %p700_p10 }
  0x1c   : > { %710 = shalt.err (!%p707_p0)
}
  0x1d   : > { %s852_s22 = smov 384   ;;  %s1120_s23 = smov 128  }
  0x1e   : > { %s1121_s24 = smov 8   ;;  %s963_s25 = sadd.s32 4294967295, %s849_s20  }
  0x1f   : > { %613 = dma.hbm_to_vmem [thread:$0]  (!%p946_p6), %s209_s6, 1024, %s211_s8, %s950_s10, %s852_s22, %s1120_s23, %s1121_s24  }
  0x20   : > { %s546_s28 = sadd.s32 4294967294, %s849_s20   ;;  %p79_p2 = scmp.ne.s32.totalorder %s833_s16, %s829_s15 }
  0x21   : > { %p1123_p3 = scmp.eq.s32.totalorder %s963_s25, 0  ;;  %p157_p4 = scmp.eq.s32.totalorder %s963_s25, 2 }
  0x22   : > { %p163_p5 = scmp.eq.s32.totalorder %s546_s28, 2  ;;  %p547_p9 = scmp.ge.s32.totalorder %s849_s20, 1 }
  0x23   : > { %p972_p8 = por %p1123_p3, %p79_p2  ;;  %p980_p10 = por %p157_p4, %p73_p1 }
  0x24   : > { %p984_p11 = por %p163_p5, %p79_p2  ;;  %p170_p12 = scmp.lt.s32.totalorder %s849_s20, 4 }
  0x25   : > { %s1127_s29 = scalar_select %p972_p8, 1, 0 }
  0x26   : > { %s1128_s30 = scalar_select %p980_p10, 1, 0 }
  0x27   : > { %s1129_s5 = scalar_select %p984_p11, 1, 0 }
  0x28   : > { %p989_p13 = pnand %p547_p9, %p170_p12  ;;  %s855_s7 = smov [#allocation2]  }
  0x29   : > { %s186_s8 = sshll.u32 %s855_s7, 4  ;;  %s552_s11 = sshll.u32 %s845_s19, 4  ;;  %s999_s8 = int_to_ptr.vmem [resolvable:$true] %s186_s8 }
  0x2a   : > { %p606_p0 = pneg %p989_p13  ;;  %s234_s14 = scalar_lea.hbm %s1118_s3, %s552_s11 }
  0x2b   : > { %s229_s22 = scalar_lea.vmem [#allocation7], %s202_s26  ;;  %s856_s7 = smov [#allocation7]  }
  0x2c   : > { %s236_s28 = sshll.u32 %s229_s22, 4  ;;  %p1005_p1 = pnand %p606_p0, %p1123_p3  ;;  %s237_s28 = int_to_ptr.vmem [resolvable:$true] %s236_s28 }
  0x2d   : > { %s724_s24 = scalar_lea.vmem %s237_s28, 16  ;;  %s729_s12 = sshll.u32 %s856_s7, 4  ;;  %s730_s12 = int_to_ptr.vmem [resolvable:$false] %s729_s12 }
  0x2e   : > { %p725_p2 = scmp.ne.s32.totalorder %s237_s28, %s724_s24  ;;  %s731_s11 = scalar_lea.vmem %s730_s12, 32 }
  0x2f   : > { %p732_p9 = scmp.lt.s32.totalorder %s237_s28, %s730_s12  ;;  %p733_p12 = scmp.lt.s32.totalorder %s731_s11, %s724_s24 }
  0x30   : > { %p727_p4 = pnand %p725_p2, %p685_p7 }
  0x31   : > { %p734_p11 = por %p733_p12, %p732_p9 }
  0x32   : > { %p728_p5 = pneg %p727_p4 }
  0x34   : > { %p735_p10 = pnand %p734_p11, %p728_p5 }
  0x36   : > { %738 = shalt.err (!%p735_p10)
}
  0x37   : > { %616 = dma.hbm_to_vmem [thread:$0]  (!%p946_p6), %s234_s14, 16, %s237_s28, %s950_s10  }
  0x38   : > { %p741_p7 = pneg %p1005_p1  ;;  %s750_s26 = scalar_lea.vmem %s999_s8, 256 }
  0x39   : > { %p751_p0 = scmp.ne.s32.totalorder %s999_s8, %s750_s26  ;;  %p758_p3 = scmp.lt.s32.totalorder %s999_s8, %s999_s8 }
  0x3a   : > { %p759_p8 = scmp.lt.s32.totalorder %s750_s26, %s750_s26 }
  0x3b   : > { %p753_p2 = pnand %p751_p0, %p741_p7 }
  0x3c   : > { %p760_p9 = por %p759_p8, %p758_p3 }
  0x3d   : > { %p754_p4 = pneg %p753_p2 }
  0x3f   : > { %p761_p11 = pnand %p760_p9, %p754_p4 }
  0x41   : > { %764 = shalt.err (!%p761_p11)
}
  0x42   : > { %s1132_s9 = smov 8   ;;  %s1133_s24 = smov 128  }
  0x43   : > { %609 = dma.hbm_to_vmem [thread:$0]  (!%p1005_p1), %s1115_s0, 256, %s999_s8, [#allocation3], %s1133_s24, %s1133_s24, %s1132_s9  }
  0x44   : > { %245 = sbr.rel (%p989_p13) target bundleno = 336 (0x150), region = 36  ;;  %p1134_p6 = scmp.eq.s32.totalorder (!%p989_p13), %s963_s25, 0 }
  0x49   : > { %816 = dma.done.wait (%p1134_p6), [#allocation3], 256   ;;  %p1135_p3 = pmov %p1134_p6 }
  0x4a   : > { %s251_s23 = sand.u32 1, %s963_s25   ;;  %s1038_s14 = sand.u32 1, %s833_s16  }
  0x4b   : > { %818 = vsyncadd (%p1135_p3), [#allocation3], 4294967040  ;;  %s555_s22 = sshll.u32 %s1038_s14, 6  ;;  %s252_s28 = scalar_lea.sflag [#allocation6], %s251_s23 }
  0x4c   : > { %s1041_s7 = scalar_lea.vmem [#allocation5], %s555_s22  ;;  %p1136_p8 = scmp.ne.s32.totalorder %s1127_s29, 0 }
  0x4e   : > { %820 = dma.done.wait (%p1136_p8), %s252_s28, 1040  }
  0x4f   : > { %822 = vsyncadd (%p1136_p8), %s252_s28, 4294966256  ;;  %v310_v0 = vld [vmem:[%s1041_s7 + $0x38] sm:$0xff]  ;;  %v309_v5 = vld [vmem:[%s1041_s7 + $0x30] sm:$0xff]  ;;  %p296_p10 = scmp.lt.s32.totalorder %s841_s18, 2  ;;  %s556_s12 = sshll.u32 %s1038_s14, 3 }
  0x50   : > { %v306_v1 = vld [vmem:[%s1041_s7 + $0x18] sm:$0xff]  ;;  %v325_v2 = vunpack.c.l.s8.bf16 %v310_v0  ;;  %v326_v3 = vunpack.c.h.s8.bf16 %v310_v0  ;;  %v324_v8 = vunpack.c.h.s8.bf16 %v309_v5  ;;  %v305_v9 = vld [vmem:[%s1041_s7 + $0x10] sm:$0xff]  ;;  %v323_v11 = vunpack.c.l.s8.bf16 %v309_v5  ;;  %v308_v12 = vld [vmem:[%s1041_s7 + $0x28] sm:$0xff]  ;;  %s263_s11 = scalar_lea.vmem [#allocation7], %s1038_s14  ;;  %s294_s26 = scalar_lea.vmem [#allocation8], %s556_s12 }
  0x51   : > { %v318_v4 = vunpack.c.h.s8.bf16 %v306_v1  ;;  %v682_v6 = vld [vmem:[#allocation2 + $0x4] ss:$8 sps:$4 sm:$0xff]   ;;  %v317_v7 = vunpack.c.l.s8.bf16 %v306_v1  ;;  %v316_v10 = vunpack.c.h.s8.bf16 %v305_v9  ;;  %v315_v13 = vunpack.c.l.s8.bf16 %v305_v9  ;;  %v304_v15 = vld [vmem:[%s1041_s7 + $0x8] sm:$0xff]  ;;  %v307_v18 = vld [vmem:[%s1041_s7 + $0x20] sm:$0xff]  ;;  %s297_s25 = scalar_select %p296_p10, %s841_s18, 2 }
  0x52   : > { %574 = vmatprep.subr.bf16.mxu0 %v326_v3  ;;  %369 = vmatprep.mubr.bf16.mxu0 %v682_v6  ;;  %v322_v14 = vunpack.c.h.s8.bf16 %v308_v12  ;;  %v314_v16 = vunpack.c.h.s8.bf16 %v304_v15  ;;  %v321_v17 = vunpack.c.l.s8.bf16 %v308_v12  ;;  %v313_v19 = vunpack.c.l.s8.bf16 %v304_v15  ;;  %v303_v21 = vld [vmem:[%s1041_s7] sm:$0xff]  ;;  %v680_v25 = vld [vmem:[#allocation2] ss:$8 sps:$4 sm:$0xff]   ;;  %s422_s9 = sshll.u32 %s294_s26, 4  ;;  %s564_s24 = sshll.u32 %s841_s18, 6  ;;  %s1063_s9 = int_to_ptr.vmem [resolvable:$true] %s422_s9 }
  0x53   : > { %575 = vmatpush3.bf16.msra.mxu0 %v318_v4  ;;  %v320_v20 = vunpack.c.h.s8.bf16 %v307_v18  ;;  %v312_v22 = vunpack.c.h.s8.bf16 %v303_v21  ;;  %v319_v23 = vunpack.c.l.s8.bf16 %v307_v18  ;;  %v311_v24 = vunpack.c.l.s8.bf16 %v303_v21  ;;  %s298_s8 = scalar_lea.vmem %s1117_s2, %s297_s25  ;;  %v560_v34 = vld [vmem:[%s263_s11] ss:$0 sm:$0xff]  ;;  %s1068_s23 = scalar_lea.hbm %s1119_s4, %s564_s24 }
  0x54   : > { %576 = vmatprep.subr.bf16.mxu0 %v325_v2  ;;  %v559_v29 = vld [vmem:[%s298_s8] ss:$0 sm:$0xff]  ;;  %s407_s22 = scalar_lea.sflag [#allocation4], %s1038_s14  ;;  %s765_s28 = scalar_lea.vmem %s1063_s9, 128 }
  0x55   : > { %p766_p13 = scmp.ne.s32.totalorder %s1063_s9, %s765_s28  ;;  %p1137_p1 = scmp.ne.s32.totalorder %s1128_s30, 0 }
  0x56   : > { %s857_s18 = smov [#allocation8]  }
  0x57   : > { %577 = vmatpush3.bf16.msra.mxu0 %v317_v7  ;;  %p767_p5 = pnand %p766_p13, %p1137_p1  ;;  %s769_s7 = sshll.u32 %s857_s18, 4  ;;  %s770_s7 = int_to_ptr.vmem [resolvable:$false] %s769_s7 }
  0x58   : > { %578 = vmatprep.subr.bf16.mxu0 %v324_v8  ;;  %s771_s25 = scalar_lea.vmem %s770_s7, 256  ;;  %p772_p7 = scmp.lt.s32.totalorder %s1063_s9, %s770_s7 }
  0x59   : > { %p768_p12 = pneg %p767_p5  ;;  %p773_p0 = scmp.lt.s32.totalorder %s771_s25, %s765_s28 }
  0x5b   : > { %579 = vmatpush3.bf16.msra.mxu0 %v316_v10  ;;  %p774_p2 = por %p773_p0, %p772_p7 }
  0x5c   : > { %580 = vmatprep.subr.bf16.mxu0 %v323_v11 }
  0x5d   : > { %p775_p4 = pnand %p774_p2, %p768_p12 }
  0x5f   : > { %581 = vmatpush3.bf16.msra.mxu0 %v315_v13 }
  0x60   : > { %582 = vmatprep.subr.bf16.mxu0 %v322_v14 }
  0x63   : > { %583 = vmatpush3.bf16.msra.mxu0 %v314_v16 }
  0x64   : > { %584 = vmatprep.subr.bf16.mxu0 %v321_v17 }
  0x67   : > { %585 = vmatpush3.bf16.msra.mxu0 %v313_v19 }
  0x68   : > { %586 = vmatprep.subr.bf16.mxu0 %v320_v20 }
  0x6b   : > { %587 = vmatpush3.bf16.msra.mxu0 %v312_v22 }
  0x6c   : > { %588 = vmatprep.subr.bf16.mxu0 %v319_v23 }
  0x6f   : > { %589 = vmatpush3.bf16.msra.mxu0 %v311_v24 }
  0x72   : > { %370 = vmatmul.mubr.bf16.vlgmr.msra.gmra.mxu0 %v680_v25 }
 0x132   : > { %v590_v26 = vpop.f32.mrf.mxu0 }
 0x134   : > { %v591_v27 = vpop.f32.mrf.mxu0 }
 0x135   : > { %v592_v28 = vadd.f32 %v591_v27, %v590_v26 }
 0x136   : > { %v593_v30 = vpop.f32.mrf.mxu0 }
 0x137   : > { %v385_v32 = vmul.f32 %v592_v28, %v559_v29 }
 0x138   : > { %v594_v31 = vpop.f32.mrf.mxu0 }
 0x139   : > { %v595_v33 = vadd.f32 %v594_v31, %v593_v30  ;;  %v394_v36 = vadd.f32 %v560_v34, %v385_v32 }
 0x13b   : > { %v386_v35 = vmul.f32 %v595_v33, %v559_v29 }
 0x13d   : > { %v395_v37 = vadd.f32 %v560_v34, %v386_v35 }
 0x13f   : > { %v572_v38 = vpack.c.bf16 %v395_v37, %v394_v36 }
 0x141   : > { %573 = vst [vmem:[%s294_s26] sm:$0xff] %v572_v38  }
 0x142   : > { %778 = shalt.err (!%p775_p4)
}
 0x143   : > { %s779_s29 = scalar_lea.hbm %s1068_s23, 128  ;;  %s783_s12 = scalar_lea.hbm %s1119_s4, 384 }
 0x144   : > { %p780_p9 = scmp.ne.s32.totalorder %s1068_s23, %s779_s29  ;;  %p784_p3 = scmp.lt.s32.totalorder %s1068_s23, %s1119_s4 }
 0x145   : > { %p785_p8 = scmp.lt.s32.totalorder %s783_s12, %s779_s29 }
 0x146   : > { %p781_p11 = pnand %p780_p9, %p1137_p1 }
 0x147   : > { %p786_p10 = por %p785_p8, %p784_p3 }
 0x148   : > { %p782_p6 = pneg %p781_p11 }
 0x14a   : > { %p787_p13 = pnand %p786_p10, %p782_p6 }
 0x14c   : > { %790 = shalt.err (!%p787_p13)
}
 0x14d   : > { %s858_s24 = smov 64   ;;  %s859_s13 = smov 192  }
 0x14e   : > { %s860_s10 = smov 4  }
 0x14f   : > { %604 = dma.vmem_to_hbm [thread:$0]  (%p1137_p1), %s1063_s9, 128, %s1068_s23, %s407_s22, %s858_s24, %s859_s13, %s860_s10  }
 0x150 PF: > { %p624_p5 = scmp.ge.s32.totalorder %s849_s20, 2  ;;  %s437_s28 = sand.u32 1, %s829_s15  }
 0x151   : > { %p1138_p12 = scmp.ne.s32.totalorder %s1129_s5, 0  ;;  %s438_s18 = scalar_lea.sflag [#allocation4], %s437_s28 }
 0x153   : > { %p618_p7 = pnand %p624_p5, %p1138_p12 }
 0x155   : > { %p619_p0 = pneg %p618_p7 }
 0x157   : > { %824 = dma.done.wait (%p619_p0), %s438_s18, 128  }
 0x158   : > { %826 = vsyncadd (%p619_p0), %s438_s18, 4294967168  ;;  %s21_s20 = sadd.s32 1, %s849_s20   ;;  %s1139_s15 = smov %s833_s16 }
 0x159   : > { %p18_p2 = scmp.ge.s32.totalorder %s21_s20, 5   ;;  %s1140_s16 = smov %s837_s17 }
 0x15a   : > { %s1141_s17 = smov %s936_s27  ;;  %s1142_s18 = smov %s845_s19 }
 0x15b   : > { %s1143_s19 = smov %s1145_s21  ;;  %20 = sbr.rel (!%p18_p2) target bundleno = 7 (0x7), region = 101 }
 0x160   :  { %443 = vsyncpa [#allocation3], 1 }
 0x161   :  { %445 = vsyncpa [#allocation3 + $0x1], 1 }
 0x162   :  { %446 = vsyncpa [#allocation6], 1 }
 0x163   :  { %448 = vsyncpa [#allocation6 + $0x1], 1 }
 0x164   :  { %449 = vsyncpa [#allocation4], 1 }
 0x165   :  { %451 = vsyncpa [#allocation4 + $0x1], 1 }

</bundles_post_ra>
